<compile_context>
chip_gen: v7x
topology: tpu7x:2x2x1
jax: 0.10.0
libtpu: 0.0.40
codegen_flags: <defaults>
</compile_context>

<pallas_src>
import functools

import jax
import jax.numpy as jnp
from jax.experimental import pallas as pl
from jax.experimental.pallas import tpu as pltpu

NUM_SAGE_LAYERS = 3
BN_EPS = 1e-5
_NUM_PHASES = 3


# ----------------------------------------------------------------------------
# Fused kernel.  Grid = (phase, batch).  Per step: adj[b] (N,N) and x[b]
# (N,Cin) are auto-pipelined VMEM blocks; weights are full VMEM blocks
# (constant block index -> fetched once); x1/x2 and BN accumulators are
# persistent VMEM scratch.
# ----------------------------------------------------------------------------
def _fused_sage_kernel(x_ref, adj_ref,
                       w1_ref, b1_ref, g1_ref, be1_ref,
                       w2_ref, b2_ref, g2_ref, be2_ref,
                       w3_ref, b3_ref, lw_ref, lb_ref,
                       o_ref,
                       x1s, x2s, s1, ss1, s2, ss2,
                       *, total_rows):
    phase = pl.program_id(0)
    b = pl.program_id(1)

    # Per-batch adjacency: DMA'd as bf16 (0/1 exact), upcast keeps f32-exact math.
    adj = adj_ref[0].astype(jnp.float32)                       # (N, N)
    deg = jnp.sum(adj, axis=-1, keepdims=True)                 # (N, 1)
    inv_deg = pl.reciprocal(jnp.maximum(deg, 1.0), approx=False)   # EUP divide

    def sage(h, w_ref, b_ref, relu):
        # Mean aggregation, then fused rel/root projection:
        #   concat([agg, h]) @ [W_rel^T; W_root^T]  (one MXU matmul per layer).
        agg = jnp.dot(adj, h, preferred_element_type=jnp.float32) * inv_deg
        hw = jnp.concatenate([agg, h], axis=-1)                # lane concat (<=128)
        out = jnp.dot(hw, w_ref[...], preferred_element_type=jnp.float32) + b_ref[...]
        return jnp.maximum(out, 0.0) if relu else out

    inv_rows = 1.0 / total_rows

    def bn_apply(h, s_ref, ss_ref, g_ref, be_ref):
        # Training-mode BatchNorm1d with statistics accumulated over ALL B*N rows.
        mean = s_ref[...] * inv_rows                           # (1, C)
        var = ss_ref[...] * inv_rows - mean * mean             # biased variance
        scale = jax.lax.rsqrt(var + BN_EPS) * g_ref[...]
        return (h - mean) * scale + be_ref[...]

    # ---- Phase 0: conv1 + relu; accumulate BN1 statistics. ----
    @pl.when(phase == 0)
    def _():
        @pl.when(b == 0)
        def _():
            s1[...] = jnp.zeros_like(s1)
            ss1[...] = jnp.zeros_like(ss1)
            s2[...] = jnp.zeros_like(s2)
            ss2[...] = jnp.zeros_like(ss2)

        h1 = sage(x_ref[0], w1_ref, b1_ref, True)              # (N, H)
        x1s[b] = h1
        s1[...] = s1[...] + jnp.sum(h1, axis=0, keepdims=True)
        ss1[...] = ss1[...] + jnp.sum(h1 * h1, axis=0, keepdims=True)

    # ---- Phase 1: BN1 -> x1; conv2 + relu; accumulate BN2 statistics. ----
    @pl.when(phase == 1)
    def _():
        x1 = bn_apply(x1s[b], s1, ss1, g1_ref, be1_ref)
        x1s[b] = x1                                            # in-place: now holds x1
        h2 = sage(x1, w2_ref, b2_ref, True)
        x2s[b] = h2
        s2[...] = s2[...] + jnp.sum(h2, axis=0, keepdims=True)
        ss2[...] = ss2[...] + jnp.sum(h2 * h2, axis=0, keepdims=True)

    # ---- Phase 2: BN2 -> x2; conv3; [x1|x2|x3] concat folded into one matmul. ----
    @pl.when(phase == 2)
    def _():
        x1 = x1s[b]
        x2 = bn_apply(x2s[b], s2, ss2, g2_ref, be2_ref)
        x3 = sage(x2, w3_ref, b3_ref, False)
        xc = jnp.concatenate([x1, x2, x3], axis=-1)            # (N, 2H + Cout)
        o_ref[0] = (jnp.dot(xc, lw_ref[...], preferred_element_type=jnp.float32)
                    + lb_ref[...])
    # Phases 0/1 leave o_ref untouched; those writebacks are overwritten in
    # phase 2 (last writer wins), which is the final grid pass over each block.


# ----------------------------------------------------------------------------
# One-time (param-load time) weight prep: transposes + rel/root stacking +
# final linear transpose.  Hoisted out of the forward path per the review.
# ----------------------------------------------------------------------------
def prepare_params(params):
    return {
        "w1": jnp.concatenate([params["w_rel1"].T, params["w_root1"].T], axis=0),
        "b1": params["b_root1"],
        "g1": params["bn1_gamma"], "be1": params["bn1_beta"],
        "w2": jnp.concatenate([params["w_rel2"].T, params["w_root2"].T], axis=0),
        "b2": params["b_root2"],
        "g2": params["bn2_gamma"], "be2": params["bn2_beta"],
        "w3": jnp.concatenate([params["w_rel3"].T, params["w_root3"].T], axis=0),
        "b3": params["b_root3"],
        "lw": params["lin_w"].T,                               # (2H + Cout, Cout)
        "lb": params["lin_b"],
    }


# ----------------------------------------------------------------------------
# Wrapper: one pallas_call, grid over (phase, batch).  jit this.
# ----------------------------------------------------------------------------
def sage_convolutions_forward(prep, x, adj):
    """x: (B, N, in_channels) f32, adj: (B, N, N) f32 (0/1). mask is None."""
    B, N, Cin = x.shape
    H = prep["w1"].shape[1]
    Cout = prep["w3"].shape[1]

    # 0/1 adjacency is exact in bf16: halves adj DMA + VMEM footprint, exact math.
    adj_bf16 = adj.astype(jnp.bfloat16)

    kernel = functools.partial(_fused_sage_kernel, total_rows=float(B * N))

    def full_spec(shape):
        return pl.BlockSpec(shape, lambda p, b, _s=len(shape): (0,) * _s)

    in_specs = [
        pl.BlockSpec((1, N, Cin), lambda p, b: (b, 0, 0)),     # x[b]
        pl.BlockSpec((1, N, N), lambda p, b: (b, 0, 0)),       # adj[b] (re-DMA'd per phase)
        full_spec(prep["w1"].shape), full_spec(prep["b1"].shape),
        full_spec(prep["g1"].shape), full_spec(prep["be1"].shape),
        full_spec(prep["w2"].shape), full_spec(prep["b2"].shape),
        full_spec(prep["g2"].shape), full_spec(prep["be2"].shape),
        full_spec(prep["w3"].shape), full_spec(prep["b3"].shape),
        full_spec(prep["lw"].shape), full_spec(prep["lb"].shape),
    ]
    out_spec = pl.BlockSpec((1, N, Cout), lambda p, b: (b, 0, 0))
    # TODO(synk): for large M, pad the final weight/bias to 128 output lanes
    # (lane-dense stores) and slice outside; not worth it at Cout=16 toy sizes.

    out = pl.pallas_call(
        kernel,
        out_shape=jax.ShapeDtypeStruct((B, N, Cout), jnp.float32),
        grid_spec=pltpu.PrefetchScalarGridSpec(
            num_scalar_prefetch=0,
            grid=(_NUM_PHASES, B),
            in_specs=in_specs,
            out_specs=out_spec,
            scratch_shapes=[
                pltpu.VMEM((B, N, H), jnp.float32),   # h1 -> x1 (persists across grid)
                pltpu.VMEM((B, N, H), jnp.float32),   # h2 -> x2
                pltpu.VMEM((1, H), jnp.float32),      # BN1 sum
                pltpu.VMEM((1, H), jnp.float32),      # BN1 sum of squares
                pltpu.VMEM((1, H), jnp.float32),      # BN2 sum
                pltpu.VMEM((1, H), jnp.float32),      # BN2 sum of squares
            ]),
        compiler_params=pltpu.CompilerParams(
            # Both axes sequential: phases are ordered and the batch axis
            # carries the cross-batch BN reduction (cannot be "parallel"
            # without splitting BN into a separate pass).
            dimension_semantics=("arbitrary", "arbitrary"),
            # Explicit scoped-VMEM cap with headroom on all of v5e/v6e/v7x.
            vmem_limit_bytes=48 * 1024 * 1024),
    )(
        x, adj_bf16,
        prep["w1"], prep["b1"], prep["g1"], prep["be1"],
        prep["w2"], prep["b2"], prep["g2"], prep["be2"],
        prep["w3"], prep["b3"], prep["lw"], prep["lb"],
    )
    # TODO(synk): for very large B*N the (B, N, H) activation scratch exceeds
    # VMEM; spill x1/x2 to HBM with manual async copies (or split BN into a
    # cheap second pallas_call) in that regime.
    return out


# ----------------------------------------------------------------------------
# Pure-JAX reference (mirrors the PyTorch module) for a sanity check.
# ----------------------------------------------------------------------------
def _reference_forward(params, x, adj):
    def conv(x, wr, wt, b, relu):
        agg = jnp.matmul(adj, x)
        deg = jnp.maximum(jnp.sum(adj, axis=-1, keepdims=True), 1.0)
        out = agg / deg @ wr.T + x @ wt.T + b
        return jnp.maximum(out, 0.0) if relu else out

    def bn(x, g, bta):
        B, N, C = x.shape
        xf = x.reshape(-1, C)
        m = xf.mean(0)
        v = ((xf - m) ** 2).mean(0)
        return (((xf - m) / jnp.sqrt(v + BN_EPS)) * g + bta).reshape(B, N, C)

    x1 = bn(conv(x, params["w_rel1"], params["w_root1"], params["b_root1"], True),
            params["bn1_gamma"][0], params["bn1_beta"][0])
    x2 = bn(conv(x1, params["w_rel2"], params["w_root2"], params["b_root2"], True),
            params["bn2_gamma"][0], params["bn2_beta"][0])
    x3 = conv(x2, params["w_rel3"], params["w_root3"], params["b_root3"], False)
    xc = jnp.concatenate([x1, x2, x3], axis=-1)
    return xc @ params["lin_w"].T + params["lin_b"]


def init_params(key, in_channels, hidden_channels, out_channels):
    def lin_init(key, fan_out, fan_in):
        bound = 1.0 / jnp.sqrt(jnp.float32(fan_in))
        return jax.random.uniform(key, (fan_out, fan_in), jnp.float32,
                                  -bound, bound)

    ks = jax.random.split(key, 12)
    lin_in = (NUM_SAGE_LAYERS - 1) * hidden_channels + out_channels
    params = {
        # conv1
        "w_rel1": lin_init(ks[0], hidden_channels, in_channels),
        "w_root1": lin_init(ks[1], hidden_channels, in_channels),
        "b_root1": jax.random.uniform(ks[2], (1, hidden_channels), jnp.float32,
                                      -0.1, 0.1),
        # conv2
        "w_rel2": lin_init(ks[3], hidden_channels, hidden_channels),
        "w_root2": lin_init(ks[4], hidden_channels, hidden_channels),
        "b_root2": jax.random.uniform(ks[5], (1, hidden_channels), jnp.float32,
                                      -0.1, 0.1),
        # conv3
        "w_rel3": lin_init(ks[6], out_channels, hidden_channels),
        "w_root3": lin_init(ks[7], out_channels, hidden_channels),
        "b_root3": jax.random.uniform(ks[8], (1, out_channels), jnp.float32,
                                      -0.1, 0.1),
        # batch norms (fresh module: gamma=1, beta=0)
        "bn1_gamma": jnp.ones((1, hidden_channels), jnp.float32),
        "bn1_beta": jnp.zeros((1, hidden_channels), jnp.float32),
        "bn2_gamma": jnp.ones((1, hidden_channels), jnp.float32),
        "bn2_beta": jnp.zeros((1, hidden_channels), jnp.float32),
        # final linear
        "lin_w": lin_init(ks[9], out_channels, lin_in),
        "lin_b": jax.random.uniform(ks[10], (1, out_channels), jnp.float32,
                                    -0.1, 0.1),
    }
    return params


if __name__ == "__main__":
    B, N = 2, 16
    in_channels, hidden_channels, out_channels = 8, 32, 16

    key = jax.random.PRNGKey(0)
    k_x, k_adj, k_p = jax.random.split(key, 3)

    x = jax.random.normal(k_x, (B, N, in_channels), jnp.float32)
    # Symmetric 0/1 dense adjacency (typical DiffPool input).
    a = (jax.random.uniform(k_adj, (B, N, N)) > 0.5).astype(jnp.float32)
    adj = jnp.maximum(a, jnp.swapaxes(a, -1, -2))

    params = init_params(k_p, in_channels, hidden_channels, out_channels)
    prep = prepare_params(params)          # one-time weight stacking/transposes

    fwd = jax.jit(sage_convolutions_forward)
    out = fwd(prep, x, adj)
    out = jax.block_until_ready(out)

    ref = _reference_forward(params, x, adj)
    assert out.shape == (B, N, out_channels)
    assert jnp.allclose(out, ref, atol=1e-4, rtol=1e-4), "mismatch vs reference"

    # TODO(synk): optional `mask` argument not exercised (mask=None path only);
    # with a mask, degree clamp and BN statistics must exclude masked nodes.
    print("KERNEL_OK")
</pallas_src>

<mosaic_0001>
module attributes {stable_mosaic.version = 11 : i64} {
  func.func @_fused_sage_kernel(%arg0: i32, %arg1: i32, %arg2: memref<1x16x8xf32, #tpu.memory_space<vmem>>, %arg3: memref<1x16x16xbf16, #tpu.memory_space<vmem>>, %arg4: memref<16x32xf32, #tpu.memory_space<vmem>>, %arg5: memref<1x32xf32, #tpu.memory_space<vmem>>, %arg6: memref<1x32xf32, #tpu.memory_space<vmem>>, %arg7: memref<1x32xf32, #tpu.memory_space<vmem>>, %arg8: memref<64x32xf32, #tpu.memory_space<vmem>>, %arg9: memref<1x32xf32, #tpu.memory_space<vmem>>, %arg10: memref<1x32xf32, #tpu.memory_space<vmem>>, %arg11: memref<1x32xf32, #tpu.memory_space<vmem>>, %arg12: memref<64x16xf32, #tpu.memory_space<vmem>>, %arg13: memref<1x16xf32, #tpu.memory_space<vmem>>, %arg14: memref<80x16xf32, #tpu.memory_space<vmem>>, %arg15: memref<1x16xf32, #tpu.memory_space<vmem>>, %arg16: memref<1x16x16xf32, #tpu.memory_space<vmem>>, %arg17: memref<2x16x32xf32, #tpu.memory_space<vmem>>, %arg18: memref<2x16x32xf32, #tpu.memory_space<vmem>>, %arg19: memref<1x32xf32, #tpu.memory_space<vmem>>, %arg20: memref<1x32xf32, #tpu.memory_space<vmem>>, %arg21: memref<1x32xf32, #tpu.memory_space<vmem>>, %arg22: memref<1x32xf32, #tpu.memory_space<vmem>>) attributes {dimension_semantics = [#tpu.dimension_semantics<arbitrary>, #tpu.dimension_semantics<arbitrary>], iteration_bounds = array<i64: 3, 2>, scalar_prefetch = 0 : i64, scratch_operands = 6 : i64, tpu.core_type = #tpu.core_type<tc>, window_params = [{transform_indices = @transform_0, window_bounds = array<i64: 1, 16, 8>}, {transform_indices = @transform_1, window_bounds = array<i64: 1, 16, 16>}, {pipeline_mode = #tpu.pipeline_mode<synchronous>, transform_indices = @transform_2, window_bounds = array<i64: 16, 32>}, {pipeline_mode = #tpu.pipeline_mode<synchronous>, transform_indices = @transform_3, window_bounds = array<i64: 1, 32>}, {pipeline_mode = #tpu.pipeline_mode<synchronous>, transform_indices = @transform_4, window_bounds = array<i64: 1, 32>}, {pipeline_mode = #tpu.pipeline_mode<synchronous>, transform_indices = @transform_5, window_bounds = array<i64: 1, 32>}, {pipeline_mode = #tpu.pipeline_mode<synchronous>, transform_indices = @transform_6, window_bounds = array<i64: 64, 32>}, {pipeline_mode = #tpu.pipeline_mode<synchronous>, transform_indices = @transform_7, window_bounds = array<i64: 1, 32>}, {pipeline_mode = #tpu.pipeline_mode<synchronous>, transform_indices = @transform_8, window_bounds = array<i64: 1, 32>}, {pipeline_mode = #tpu.pipeline_mode<synchronous>, transform_indices = @transform_9, window_bounds = array<i64: 1, 32>}, {pipeline_mode = #tpu.pipeline_mode<synchronous>, transform_indices = @transform_10, window_bounds = array<i64: 64, 16>}, {pipeline_mode = #tpu.pipeline_mode<synchronous>, transform_indices = @transform_11, window_bounds = array<i64: 1, 16>}, {pipeline_mode = #tpu.pipeline_mode<synchronous>, transform_indices = @transform_12, window_bounds = array<i64: 80, 16>}, {pipeline_mode = #tpu.pipeline_mode<synchronous>, transform_indices = @transform_13, window_bounds = array<i64: 1, 16>}, {transform_indices = @transform_14, window_bounds = array<i64: 1, 16, 16>}]} {
    %c0 = arith.constant 0 : index
    %c0_0 = arith.constant 0 : index
    %c0_1 = arith.constant 0 : index
    %0 = vector.load %arg3[%c0, %c0_0, %c0_1] : memref<1x16x16xbf16, #tpu.memory_space<vmem>>, vector<1x16x16xbf16>
    %1 = vector.shape_cast %0 : vector<1x16x16xbf16> to vector<16x16xbf16>
    %2 = arith.extf %1 : vector<16x16xbf16> to vector<16x16xf32>
    %cst = arith.constant dense<0.000000e+00> : vector<16xf32>
    %3 = vector.multi_reduction <add>, %2, %cst [1] : vector<16x16xf32> to vector<16xf32>
    %4 = vector.shape_cast %3 : vector<16xf32> to vector<16x1xf32>
    %cst_2 = arith.constant 1.000000e+00 : f32
    %5 = vector.broadcast %cst_2 : f32 to vector<16x1xf32>
    %6 = arith.maximumf %4, %5 : vector<16x1xf32>
    %7 = tpu.reciprocal %6 : vector<16x1xf32> -> vector<16x1xf32>
    %c0_i32 = arith.constant 0 : i32
    %8 = arith.cmpi eq, %arg0, %c0_i32 : i32
    %9 = arith.extui %8 : i1 to i32
    %c0_i32_3 = arith.constant 0 : i32
    %10 = arith.cmpi ne, %9, %c0_i32_3 : i32
    scf.if %10 {
      %c0_i32_6 = arith.constant 0 : i32
      %17 = arith.cmpi eq, %arg1, %c0_i32_6 : i32
      %18 = arith.extui %17 : i1 to i32
      %c0_i32_7 = arith.constant 0 : i32
      %19 = arith.cmpi ne, %18, %c0_i32_7 : i32
      scf.if %19 {
        %cst_30 = arith.constant 0.000000e+00 : f32
        %48 = vector.broadcast %cst_30 : f32 to vector<1x32xf32>
        %c0_31 = arith.constant 0 : index
        %c0_32 = arith.constant 0 : index
        %49 = vector.load %arg19[%c0_31, %c0_32] : memref<1x32xf32, #tpu.memory_space<vmem>>, vector<1x32xf32>
        tpu.vector_store %arg19[%c0_31, %c0_32], %48 {strides = array<i32>} : memref<1x32xf32, #tpu.memory_space<vmem>>, vector<1x32xf32>,
        %cst_33 = arith.constant 0.000000e+00 : f32
        %50 = vector.broadcast %cst_33 : f32 to vector<1x32xf32>
        %c0_34 = arith.constant 0 : index
        %c0_35 = arith.constant 0 : index
        %51 = vector.load %arg20[%c0_34, %c0_35] : memref<1x32xf32, #tpu.memory_space<vmem>>, vector<1x32xf32>
        tpu.vector_store %arg20[%c0_34, %c0_35], %50 {strides = array<i32>} : memref<1x32xf32, #tpu.memory_space<vmem>>, vector<1x32xf32>,
        %cst_36 = arith.constant 0.000000e+00 : f32
        %52 = vector.broadcast %cst_36 : f32 to vector<1x32xf32>
        %c0_37 = arith.constant 0 : index
        %c0_38 = arith.constant 0 : index
        %53 = vector.load %arg21[%c0_37, %c0_38] : memref<1x32xf32, #tpu.memory_space<vmem>>, vector<1x32xf32>
        tpu.vector_store %arg21[%c0_37, %c0_38], %52 {strides = array<i32>} : memref<1x32xf32, #tpu.memory_space<vmem>>, vector<1x32xf32>,
        %cst_39 = arith.constant 0.000000e+00 : f32
        %54 = vector.broadcast %cst_39 : f32 to vector<1x32xf32>
        %c0_40 = arith.constant 0 : index
        %c0_41 = arith.constant 0 : index
        %55 = vector.load %arg22[%c0_40, %c0_41] : memref<1x32xf32, #tpu.memory_space<vmem>>, vector<1x32xf32>
        tpu.vector_store %arg22[%c0_40, %c0_41], %54 {strides = array<i32>} : memref<1x32xf32, #tpu.memory_space<vmem>>, vector<1x32xf32>,
      } else {
      }
      %c0_8 = arith.constant 0 : index
      %c0_9 = arith.constant 0 : index
      %c0_10 = arith.constant 0 : index
      %20 = vector.load %arg2[%c0_8, %c0_9, %c0_10] : memref<1x16x8xf32, #tpu.memory_space<vmem>>, vector<1x16x8xf32>
      %21 = vector.shape_cast %20 : vector<1x16x8xf32> to vector<16x8xf32>
      %cst_11 = arith.constant dense<0.000000e+00> : vector<16x8xf32>
      %22 = tpu.matmul %2, %21, %cst_11 {dimension_numbers = #tpu.dot_dimension_numbers<[1], [0], [0], [1], [0, 0, 1, 1], [], []>} : vector<16x16xf32>, vector<16x8xf32>, vector<16x8xf32> -> vector<16x8xf32>
      %23 = vector.broadcast %7 : vector<16x1xf32> to vector<16x8xf32>
      %24 = arith.mulf %22, %23 : vector<16x8xf32>
      %25 = tpu.concatenate %24, %21 in 1 : vector<16x8xf32>, vector<16x8xf32> -> vector<16x16xf32>
      %c0_12 = arith.constant 0 : index
      %c0_13 = arith.constant 0 : index
      %26 = vector.load %arg4[%c0_12, %c0_13] : memref<16x32xf32, #tpu.memory_space<vmem>>, vector<16x32xf32>
      %cst_14 = arith.constant dense<0.000000e+00> : vector<16x32xf32>
      %27 = tpu.matmul %25, %26, %cst_14 {dimension_numbers = #tpu.dot_dimension_numbers<[1], [0], [0], [1], [0, 0, 1, 1], [], []>} : vector<16x16xf32>, vector<16x32xf32>, vector<16x32xf32> -> vector<16x32xf32>
      %c0_15 = arith.constant 0 : index
      %c0_16 = arith.constant 0 : index
      %28 = vector.load %arg5[%c0_15, %c0_16] : memref<1x32xf32, #tpu.memory_space<vmem>>, vector<1x32xf32>
      %29 = vector.broadcast %28 : vector<1x32xf32> to vector<16x32xf32>
      %30 = arith.addf %27, %29 : vector<16x32xf32>
      %cst_17 = arith.constant 0.000000e+00 : f32
      %31 = vector.broadcast %cst_17 : f32 to vector<16x32xf32>
      %32 = arith.maximumf %30, %31 : vector<16x32xf32>
      %33 = arith.index_cast %arg1 : i32 to index
      %c0_18 = arith.constant 0 : index
      %c0_19 = arith.constant 0 : index
      %34 = vector.load %arg17[%33, %c0_18, %c0_19] : memref<2x16x32xf32, #tpu.memory_space<vmem>>, vector<1x16x32xf32>
      %35 = vector.shape_cast %34 : vector<1x16x32xf32> to vector<16x32xf32>
      %36 = vector.shape_cast %32 : vector<16x32xf32> to vector<1x16x32xf32>
      tpu.vector_store %arg17[%33, %c0_18, %c0_19], %36 {strides = array<i32>} : memref<2x16x32xf32, #tpu.memory_space<vmem>>, vector<1x16x32xf32>,
      %c0_20 = arith.constant 0 : index
      %c0_21 = arith.constant 0 : index
      %37 = vector.load %arg19[%c0_20, %c0_21] : memref<1x32xf32, #tpu.memory_space<vmem>>, vector<1x32xf32>
      %cst_22 = arith.constant dense<0.000000e+00> : vector<32xf32>
      %38 = vector.multi_reduction <add>, %32, %cst_22 [0] : vector<16x32xf32> to vector<32xf32>
      %39 = vector.shape_cast %38 : vector<32xf32> to vector<1x32xf32>
      %40 = arith.addf %37, %39 : vector<1x32xf32>
      %c0_23 = arith.constant 0 : index
      %c0_24 = arith.constant 0 : index
      %41 = vector.load %arg19[%c0_23, %c0_24] : memref<1x32xf32, #tpu.memory_space<vmem>>, vector<1x32xf32>
      tpu.vector_store %arg19[%c0_23, %c0_24], %40 {strides = array<i32>} : memref<1x32xf32, #tpu.memory_space<vmem>>, vector<1x32xf32>,
      %c0_25 = arith.constant 0 : index
      %c0_26 = arith.constant 0 : index
      %42 = vector.load %arg20[%c0_25, %c0_26] : memref<1x32xf32, #tpu.memory_space<vmem>>, vector<1x32xf32>
      %43 = arith.mulf %32, %32 : vector<16x32xf32>
      %cst_27 = arith.constant dense<0.000000e+00> : vector<32xf32>
      %44 = vector.multi_reduction <add>, %43, %cst_27 [0] : vector<16x32xf32> to vector<32xf32>
      %45 = vector.shape_cast %44 : vector<32xf32> to vector<1x32xf32>
      %46 = arith.addf %42, %45 : vector<1x32xf32>
      %c0_28 = arith.constant 0 : index
      %c0_29 = arith.constant 0 : index
      %47 = vector.load %arg20[%c0_28, %c0_29] : memref<1x32xf32, #tpu.memory_space<vmem>>, vector<1x32xf32>
      tpu.vector_store %arg20[%c0_28, %c0_29], %46 {strides = array<i32>} : memref<1x32xf32, #tpu.memory_space<vmem>>, vector<1x32xf32>,
    } else {
    }
    %c1_i32 = arith.constant 1 : i32
    %11 = arith.cmpi eq, %arg0, %c1_i32 : i32
    %12 = arith.extui %11 : i1 to i32
    %c0_i32_4 = arith.constant 0 : i32
    %13 = arith.cmpi ne, %12, %c0_i32_4 : i32
    scf.if %13 {
      %17 = arith.index_cast %arg1 : i32 to index
      %c0_6 = arith.constant 0 : index
      %c0_7 = arith.constant 0 : index
      %18 = vector.load %arg17[%17, %c0_6, %c0_7] : memref<2x16x32xf32, #tpu.memory_space<vmem>>, vector<1x16x32xf32>
      %19 = vector.shape_cast %18 : vector<1x16x32xf32> to vector<16x32xf32>
      %c0_8 = arith.constant 0 : index
      %c0_9 = arith.constant 0 : index
      %20 = vector.load %arg19[%c0_8, %c0_9] : memref<1x32xf32, #tpu.memory_space<vmem>>, vector<1x32xf32>
      %cst_10 = arith.constant 3.125000e-02 : f32
      %21 = vector.broadcast %cst_10 : f32 to vector<1x32xf32>
      %22 = arith.mulf %20, %21 : vector<1x32xf32>
      %c0_11 = arith.constant 0 : index
      %c0_12 = arith.constant 0 : index
      %23 = vector.load %arg20[%c0_11, %c0_12] : memref<1x32xf32, #tpu.memory_space<vmem>>, vector<1x32xf32>
      %cst_13 = arith.constant 3.125000e-02 : f32
      %24 = vector.broadcast %cst_13 : f32 to vector<1x32xf32>
      %25 = arith.mulf %23, %24 : vector<1x32xf32>
      %26 = arith.mulf %22, %22 : vector<1x32xf32>
      %27 = arith.subf %25, %26 : vector<1x32xf32>
      %cst_14 = arith.constant 9.99999974E-6 : f32
      %28 = vector.broadcast %cst_14 : f32 to vector<1x32xf32>
      %29 = arith.addf %27, %28 : vector<1x32xf32>
      %30 = math.rsqrt %29 : vector<1x32xf32>
      %c0_15 = arith.constant 0 : index
      %c0_16 = arith.constant 0 : index
      %31 = vector.load %arg6[%c0_15, %c0_16] : memref<1x32xf32, #tpu.memory_space<vmem>>, vector<1x32xf32>
      %32 = arith.mulf %30, %31 : vector<1x32xf32>
      %33 = vector.broadcast %22 : vector<1x32xf32> to vector<16x32xf32>
      %34 = arith.subf %19, %33 : vector<16x32xf32>
      %35 = vector.broadcast %32 : vector<1x32xf32> to vector<16x32xf32>
      %36 = arith.mulf %34, %35 : vector<16x32xf32>
      %c0_17 = arith.constant 0 : index
      %c0_18 = arith.constant 0 : index
      %37 = vector.load %arg7[%c0_17, %c0_18] : memref<1x32xf32, #tpu.memory_space<vmem>>, vector<1x32xf32>
      %38 = vector.broadcast %37 : vector<1x32xf32> to vector<16x32xf32>
      %39 = arith.addf %36, %38 : vector<16x32xf32>
      %40 = arith.index_cast %arg1 : i32 to index
      %c0_19 = arith.constant 0 : index
      %c0_20 = arith.constant 0 : index
      %41 = vector.load %arg17[%40, %c0_19, %c0_20] : memref<2x16x32xf32, #tpu.memory_space<vmem>>, vector<1x16x32xf32>
      %42 = vector.shape_cast %41 : vector<1x16x32xf32> to vector<16x32xf32>
      %43 = vector.shape_cast %39 : vector<16x32xf32> to vector<1x16x32xf32>
      tpu.vector_store %arg17[%40, %c0_19, %c0_20], %43 {strides = array<i32>} : memref<2x16x32xf32, #tpu.memory_space<vmem>>, vector<1x16x32xf32>,
      %cst_21 = arith.constant dense<0.000000e+00> : vector<16x32xf32>
      %44 = tpu.matmul %2, %39, %cst_21 {dimension_numbers = #tpu.dot_dimension_numbers<[1], [0], [0], [1], [0, 0, 1, 1], [], []>} : vector<16x16xf32>, vector<16x32xf32>, vector<16x32xf32> -> vector<16x32xf32>
      %45 = vector.broadcast %7 : vector<16x1xf32> to vector<16x32xf32>
      %46 = arith.mulf %44, %45 : vector<16x32xf32>
      %47 = tpu.concatenate %46, %39 in 1 : vector<16x32xf32>, vector<16x32xf32> -> vector<16x64xf32>
      %c0_22 = arith.constant 0 : index
      %c0_23 = arith.constant 0 : index
      %48 = vector.load %arg8[%c0_22, %c0_23] : memref<64x32xf32, #tpu.memory_space<vmem>>, vector<64x32xf32>
      %cst_24 = arith.constant dense<0.000000e+00> : vector<16x32xf32>
      %49 = tpu.matmul %47, %48, %cst_24 {dimension_numbers = #tpu.dot_dimension_numbers<[1], [0], [0], [1], [0, 0, 1, 1], [], []>} : vector<16x64xf32>, vector<64x32xf32>, vector<16x32xf32> -> vector<16x32xf32>
      %c0_25 = arith.constant 0 : index
      %c0_26 = arith.constant 0 : index
      %50 = vector.load %arg9[%c0_25, %c0_26] : memref<1x32xf32, #tpu.memory_space<vmem>>, vector<1x32xf32>
      %51 = vector.broadcast %50 : vector<1x32xf32> to vector<16x32xf32>
      %52 = arith.addf %49, %51 : vector<16x32xf32>
      %cst_27 = arith.constant 0.000000e+00 : f32
      %53 = vector.broadcast %cst_27 : f32 to vector<16x32xf32>
      %54 = arith.maximumf %52, %53 : vector<16x32xf32>
      %55 = arith.index_cast %arg1 : i32 to index
      %c0_28 = arith.constant 0 : index
      %c0_29 = arith.constant 0 : index
      %56 = vector.load %arg18[%55, %c0_28, %c0_29] : memref<2x16x32xf32, #tpu.memory_space<vmem>>, vector<1x16x32xf32>
      %57 = vector.shape_cast %56 : vector<1x16x32xf32> to vector<16x32xf32>
      %58 = vector.shape_cast %54 : vector<16x32xf32> to vector<1x16x32xf32>
      tpu.vector_store %arg18[%55, %c0_28, %c0_29], %58 {strides = array<i32>} : memref<2x16x32xf32, #tpu.memory_space<vmem>>, vector<1x16x32xf32>,
      %c0_30 = arith.constant 0 : index
      %c0_31 = arith.constant 0 : index
      %59 = vector.load %arg21[%c0_30, %c0_31] : memref<1x32xf32, #tpu.memory_space<vmem>>, vector<1x32xf32>
      %cst_32 = arith.constant dense<0.000000e+00> : vector<32xf32>
      %60 = vector.multi_reduction <add>, %54, %cst_32 [0] : vector<16x32xf32> to vector<32xf32>
      %61 = vector.shape_cast %60 : vector<32xf32> to vector<1x32xf32>
      %62 = arith.addf %59, %61 : vector<1x32xf32>
      %c0_33 = arith.constant 0 : index
      %c0_34 = arith.constant 0 : index
      %63 = vector.load %arg21[%c0_33, %c0_34] : memref<1x32xf32, #tpu.memory_space<vmem>>, vector<1x32xf32>
      tpu.vector_store %arg21[%c0_33, %c0_34], %62 {strides = array<i32>} : memref<1x32xf32, #tpu.memory_space<vmem>>, vector<1x32xf32>,
      %c0_35 = arith.constant 0 : index
      %c0_36 = arith.constant 0 : index
      %64 = vector.load %arg22[%c0_35, %c0_36] : memref<1x32xf32, #tpu.memory_space<vmem>>, vector<1x32xf32>
      %65 = arith.mulf %54, %54 : vector<16x32xf32>
      %cst_37 = arith.constant dense<0.000000e+00> : vector<32xf32>
      %66 = vector.multi_reduction <add>, %65, %cst_37 [0] : vector<16x32xf32> to vector<32xf32>
      %67 = vector.shape_cast %66 : vector<32xf32> to vector<1x32xf32>
      %68 = arith.addf %64, %67 : vector<1x32xf32>
      %c0_38 = arith.constant 0 : index
      %c0_39 = arith.constant 0 : index
      %69 = vector.load %arg22[%c0_38, %c0_39] : memref<1x32xf32, #tpu.memory_space<vmem>>, vector<1x32xf32>
      tpu.vector_store %arg22[%c0_38, %c0_39], %68 {strides = array<i32>} : memref<1x32xf32, #tpu.memory_space<vmem>>, vector<1x32xf32>,
    } else {
    }
    %c2_i32 = arith.constant 2 : i32
    %14 = arith.cmpi eq, %arg0, %c2_i32 : i32
    %15 = arith.extui %14 : i1 to i32
    %c0_i32_5 = arith.constant 0 : i32
    %16 = arith.cmpi ne, %15, %c0_i32_5 : i32
    scf.if %16 {
      %17 = arith.index_cast %arg1 : i32 to index
      %c0_6 = arith.constant 0 : index
      %c0_7 = arith.constant 0 : index
      %18 = vector.load %arg17[%17, %c0_6, %c0_7] : memref<2x16x32xf32, #tpu.memory_space<vmem>>, vector<1x16x32xf32>
      %19 = vector.shape_cast %18 : vector<1x16x32xf32> to vector<16x32xf32>
      %20 = arith.index_cast %arg1 : i32 to index
      %c0_8 = arith.constant 0 : index
      %c0_9 = arith.constant 0 : index
      %21 = vector.load %arg18[%20, %c0_8, %c0_9] : memref<2x16x32xf32, #tpu.memory_space<vmem>>, vector<1x16x32xf32>
      %22 = vector.shape_cast %21 : vector<1x16x32xf32> to vector<16x32xf32>
      %c0_10 = arith.constant 0 : index
      %c0_11 = arith.constant 0 : index
      %23 = vector.load %arg21[%c0_10, %c0_11] : memref<1x32xf32, #tpu.memory_space<vmem>>, vector<1x32xf32>
      %cst_12 = arith.constant 3.125000e-02 : f32
      %24 = vector.broadcast %cst_12 : f32 to vector<1x32xf32>
      %25 = arith.mulf %23, %24 : vector<1x32xf32>
      %c0_13 = arith.constant 0 : index
      %c0_14 = arith.constant 0 : index
      %26 = vector.load %arg22[%c0_13, %c0_14] : memref<1x32xf32, #tpu.memory_space<vmem>>, vector<1x32xf32>
      %cst_15 = arith.constant 3.125000e-02 : f32
      %27 = vector.broadcast %cst_15 : f32 to vector<1x32xf32>
      %28 = arith.mulf %26, %27 : vector<1x32xf32>
      %29 = arith.mulf %25, %25 : vector<1x32xf32>
      %30 = arith.subf %28, %29 : vector<1x32xf32>
      %cst_16 = arith.constant 9.99999974E-6 : f32
      %31 = vector.broadcast %cst_16 : f32 to vector<1x32xf32>
      %32 = arith.addf %30, %31 : vector<1x32xf32>
      %33 = math.rsqrt %32 : vector<1x32xf32>
      %c0_17 = arith.constant 0 : index
      %c0_18 = arith.constant 0 : index
      %34 = vector.load %arg10[%c0_17, %c0_18] : memref<1x32xf32, #tpu.memory_space<vmem>>, vector<1x32xf32>
      %35 = arith.mulf %33, %34 : vector<1x32xf32>
      %36 = vector.broadcast %25 : vector<1x32xf32> to vector<16x32xf32>
      %37 = arith.subf %22, %36 : vector<16x32xf32>
      %38 = vector.broadcast %35 : vector<1x32xf32> to vector<16x32xf32>
      %39 = arith.mulf %37, %38 : vector<16x32xf32>
      %c0_19 = arith.constant 0 : index
      %c0_20 = arith.constant 0 : index
      %40 = vector.load %arg11[%c0_19, %c0_20] : memref<1x32xf32, #tpu.memory_space<vmem>>, vector<1x32xf32>
      %41 = vector.broadcast %40 : vector<1x32xf32> to vector<16x32xf32>
      %42 = arith.addf %39, %41 : vector<16x32xf32>
      %cst_21 = arith.constant dense<0.000000e+00> : vector<16x32xf32>
      %43 = tpu.matmul %2, %42, %cst_21 {dimension_numbers = #tpu.dot_dimension_numbers<[1], [0], [0], [1], [0, 0, 1, 1], [], []>} : vector<16x16xf32>, vector<16x32xf32>, vector<16x32xf32> -> vector<16x32xf32>
      %44 = vector.broadcast %7 : vector<16x1xf32> to vector<16x32xf32>
      %45 = arith.mulf %43, %44 : vector<16x32xf32>
      %46 = tpu.concatenate %45, %42 in 1 : vector<16x32xf32>, vector<16x32xf32> -> vector<16x64xf32>
      %c0_22 = arith.constant 0 : index
      %c0_23 = arith.constant 0 : index
      %47 = vector.load %arg12[%c0_22, %c0_23] : memref<64x16xf32, #tpu.memory_space<vmem>>, vector<64x16xf32>
      %cst_24 = arith.constant dense<0.000000e+00> : vector<16x16xf32>
      %48 = tpu.matmul %46, %47, %cst_24 {dimension_numbers = #tpu.dot_dimension_numbers<[1], [0], [0], [1], [0, 0, 1, 1], [], []>} : vector<16x64xf32>, vector<64x16xf32>, vector<16x16xf32> -> vector<16x16xf32>
      %c0_25 = arith.constant 0 : index
      %c0_26 = arith.constant 0 : index
      %49 = vector.load %arg13[%c0_25, %c0_26] : memref<1x16xf32, #tpu.memory_space<vmem>>, vector<1x16xf32>
      %50 = vector.broadcast %49 : vector<1x16xf32> to vector<16x16xf32>
      %51 = arith.addf %48, %50 : vector<16x16xf32>
      %52 = tpu.concatenate %19, %42, %51 in 1 : vector<16x32xf32>, vector<16x32xf32>, vector<16x16xf32> -> vector<16x80xf32>
      %c0_27 = arith.constant 0 : index
      %c0_28 = arith.constant 0 : index
      %53 = vector.load %arg14[%c0_27, %c0_28] : memref<80x16xf32, #tpu.memory_space<vmem>>, vector<80x16xf32>
      %cst_29 = arith.constant dense<0.000000e+00> : vector<16x16xf32>
      %54 = tpu.matmul %52, %53, %cst_29 {dimension_numbers = #tpu.dot_dimension_numbers<[1], [0], [0], [1], [0, 0, 1, 1], [], []>} : vector<16x80xf32>, vector<80x16xf32>, vector<16x16xf32> -> vector<16x16xf32>
      %c0_30 = arith.constant 0 : index
      %c0_31 = arith.constant 0 : index
      %55 = vector.load %arg15[%c0_30, %c0_31] : memref<1x16xf32, #tpu.memory_space<vmem>>, vector<1x16xf32>
      %56 = vector.broadcast %55 : vector<1x16xf32> to vector<16x16xf32>
      %57 = arith.addf %54, %56 : vector<16x16xf32>
      %c0_32 = arith.constant 0 : index
      %c0_33 = arith.constant 0 : index
      %c0_34 = arith.constant 0 : index
      %58 = vector.load %arg16[%c0_32, %c0_33, %c0_34] : memref<1x16x16xf32, #tpu.memory_space<vmem>>, vector<1x16x16xf32>
      %59 = vector.shape_cast %58 : vector<1x16x16xf32> to vector<16x16xf32>
      %60 = vector.shape_cast %57 : vector<16x16xf32> to vector<1x16x16xf32>
      tpu.vector_store %arg16[%c0_32, %c0_33, %c0_34], %60 {strides = array<i32>} : memref<1x16x16xf32, #tpu.memory_space<vmem>>, vector<1x16x16xf32>,
    } else {
    }
    return
  }
  func.func @transform_0(%arg0: i32, %arg1: i32) -> (i32, i32, i32) {
    %c0_i32 = arith.constant 0 : i32
    %c0_i32_0 = arith.constant 0 : i32
    %c0_i32_1 = arith.constant 0 : i32
    return %arg1, %c0_i32, %c0_i32_0 : i32, i32, i32
  }
  func.func @transform_1(%arg0: i32, %arg1: i32) -> (i32, i32, i32) {
    %c0_i32 = arith.constant 0 : i32
    %c0_i32_0 = arith.constant 0 : i32
    %c0_i32_1 = arith.constant 0 : i32
    return %arg1, %c0_i32, %c0_i32_0 : i32, i32, i32
  }
  func.func @transform_2(%arg0: i32, %arg1: i32) -> (i32, i32) {
    %c0_i32 = arith.constant 0 : i32
    %c0_i32_0 = arith.constant 0 : i32
    %c0_i32_1 = arith.constant 0 : i32
    return %c0_i32, %c0_i32_0 : i32, i32
  }
  func.func @transform_3(%arg0: i32, %arg1: i32) -> (i32, i32) {
    %c0_i32 = arith.constant 0 : i32
    %c0_i32_0 = arith.constant 0 : i32
    %c0_i32_1 = arith.constant 0 : i32
    return %c0_i32, %c0_i32_0 : i32, i32
  }
  func.func @transform_4(%arg0: i32, %arg1: i32) -> (i32, i32) {
    %c0_i32 = arith.constant 0 : i32
    %c0_i32_0 = arith.constant 0 : i32
    %c0_i32_1 = arith.constant 0 : i32
    return %c0_i32, %c0_i32_0 : i32, i32
  }
  func.func @transform_5(%arg0: i32, %arg1: i32) -> (i32, i32) {
    %c0_i32 = arith.constant 0 : i32
    %c0_i32_0 = arith.constant 0 : i32
    %c0_i32_1 = arith.constant 0 : i32
    return %c0_i32, %c0_i32_0 : i32, i32
  }
  func.func @transform_6(%arg0: i32, %arg1: i32) -> (i32, i32) {
    %c0_i32 = arith.constant 0 : i32
    %c0_i32_0 = arith.constant 0 : i32
    %c0_i32_1 = arith.constant 0 : i32
    return %c0_i32, %c0_i32_0 : i32, i32
  }
  func.func @transform_7(%arg0: i32, %arg1: i32) -> (i32, i32) {
    %c0_i32 = arith.constant 0 : i32
    %c0_i32_0 = arith.constant 0 : i32
    %c0_i32_1 = arith.constant 0 : i32
    return %c0_i32, %c0_i32_0 : i32, i32
  }
  func.func @transform_8(%arg0: i32, %arg1: i32) -> (i32, i32) {
    %c0_i32 = arith.constant 0 : i32
    %c0_i32_0 = arith.constant 0 : i32
    %c0_i32_1 = arith.constant 0 : i32
    return %c0_i32, %c0_i32_0 : i32, i32
  }
  func.func @transform_9(%arg0: i32, %arg1: i32) -> (i32, i32) {
    %c0_i32 = arith.constant 0 : i32
    %c0_i32_0 = arith.constant 0 : i32
    %c0_i32_1 = arith.constant 0 : i32
    return %c0_i32, %c0_i32_0 : i32, i32
  }
  func.func @transform_10(%arg0: i32, %arg1: i32) -> (i32, i32) {
    %c0_i32 = arith.constant 0 : i32
    %c0_i32_0 = arith.constant 0 : i32
    %c0_i32_1 = arith.constant 0 : i32
    return %c0_i32, %c0_i32_0 : i32, i32
  }
  func.func @transform_11(%arg0: i32, %arg1: i32) -> (i32, i32) {
    %c0_i32 = arith.constant 0 : i32
    %c0_i32_0 = arith.constant 0 : i32
    %c0_i32_1 = arith.constant 0 : i32
    return %c0_i32, %c0_i32_0 : i32, i32
  }
  func.func @transform_12(%arg0: i32, %arg1: i32) -> (i32, i32) {
    %c0_i32 = arith.constant 0 : i32
    %c0_i32_0 = arith.constant 0 : i32
    %c0_i32_1 = arith.constant 0 : i32
    return %c0_i32, %c0_i32_0 : i32, i32
  }
  func.func @transform_13(%arg0: i32, %arg1: i32) -> (i32, i32) {
    %c0_i32 = arith.constant 0 : i32
    %c0_i32_0 = arith.constant 0 : i32
    %c0_i32_1 = arith.constant 0 : i32
    return %c0_i32, %c0_i32_0 : i32, i32
  }
  func.func @transform_14(%arg0: i32, %arg1: i32) -> (i32, i32, i32) {
    %c0_i32 = arith.constant 0 : i32
    %c0_i32_0 = arith.constant 0 : i32
    %c0_i32_1 = arith.constant 0 : i32
    return %arg1, %c0_i32, %c0_i32_0 : i32, i32, i32
  }
}

</mosaic_0001>

<bundles_post_ra>
// kernel: sage_convolutions_forward.1
= control target key start
LH: loop header
LB: loop body
LE: loop exit
PB: predicated region body
PF: predicated region fallthrough
CT: control target
= control target key end

     0   :  { %s2318_s0 = inlined_call_operand.vmem [shape: f32[2,16,8], index: 0, kind: input, shape index: {}]   ;;  %s2319_s1 = inlined_call_operand.vmem [shape: bf16[2,16,16], index: 1, kind: input, shape index: {}]   ;;  %s2320_s2 = inlined_call_operand.vmem [shape: f32[16,32], index: 2, kind: input, shape index: {}]   ;;  %s2321_s3 = inlined_call_operand.vmem [shape: f32[1,32], index: 3, kind: input, shape index: {}]   ;;  %s2322_s4 = inlined_call_operand.vmem [shape: f32[1,32], index: 4, kind: input, shape index: {}]   ;;  %s2323_s5 = inlined_call_operand.vmem [shape: f32[1,32], index: 5, kind: input, shape index: {}]   ;;  %s2324_s6 = inlined_call_operand.vmem [shape: f32[64,32], index: 6, kind: input, shape index: {}]   ;;  %s2325_s7 = inlined_call_operand.vmem [shape: f32[1,32], index: 7, kind: input, shape index: {}]   ;;  %s2326_s8 = inlined_call_operand.vmem [shape: f32[1,32], index: 8, kind: input, shape index: {}]   ;;  %s2327_s9 = inlined_call_operand.vmem [shape: f32[1,32], index: 9, kind: input, shape index: {}]   ;;  %s2328_s10 = inlined_call_operand.vmem [shape: f32[64,16], index: 10, kind: input, shape index: {}]   ;;  %s2329_s11 = inlined_call_operand.vmem [shape: f32[1,16], index: 11, kind: input, shape index: {}]   ;;  %s2330_s12 = inlined_call_operand.vmem [shape: f32[80,16], index: 12, kind: input, shape index: {}]   ;;  %s2331_s13 = inlined_call_operand.vmem [shape: f32[1,16], index: 13, kind: input, shape index: {}]   ;;  %s2332_s14 = inlined_call_operand.hbm [shape: f32[2,16,16], index: 14, kind: output, shape index: {}]  }
   0x1   :  { %2339 = sst [smem:[#allocation16_spill]] %s2318_s0 }
   0x2   :  { %2340 = sst [smem:[#allocation17_spill]] %s2332_s14 }
   0x3   :  { %19 = vsyncpa [#allocation9], 0 }
   0x4   :  { %21 = vsyncpa [#allocation9 + $0x1], 0  ;;  %s1992_s29 = smov 0   ;;  %s1994_s30 = smov 0  }
   0x5   :  { %s1996_s15 = smov 0   ;;  %s1998_s16 = smov 0  }
   0x6   :  { %s2000_s17 = smov 0   ;;  %s2002_s18 = smov 0  }
   0x7   :  { %s2004_s19 = smov 0   ;;  %s2006_s20 = smov 0  }
   0x8 LB: > { %2341 = sst [smem:[#allocation11_spill]] %s1899_s18  ;;  %s1473_s21 = sadd.s32 4294967295, %s1907_s20   ;;  %s1907_s20 = sphi %s2006_s20, %s27_s20   ;;  %s1903_s19 = sphi %s2004_s19, %s2356_s19   ;;  %s1899_s18 = sphi %s2002_s18, %s2355_s18   ;;  %s1895_s17 = sphi %s2000_s17, %s2354_s17   ;;  %s1891_s16 = sphi %s1998_s16, %s2353_s16   ;;  %s1887_s15 = sphi %s1996_s15, %s2359_s15   ;;  %s1883_s30 = sphi %s1994_s30, %s2358_s30   ;;  %s1879_s29 = sphi %s1992_s29, %s2357_s29  }
   0x9   : > { %2342 = sst [smem:[#allocation12_spill]] %s1903_s19  ;;  %s1474_s22 = sadd.s32 4294967294, %s1907_s20  }
   0xa   : > { %s36_s23 = sadd.s32 1, %s1899_s18  ;;  %s39_s24 = sadd.s32 1, %s1903_s19 }
   0xb   : > { %p37_p0 = scmp.ge.s32.totalorder %s36_s23, 2  ;;  %s350_s25 = sadd.s32 1, %s1887_s15 }
   0xc   : > { %p360_p1 = scmp.ne.s32.totalorder %s1887_s15, %s1883_s30  ;;  %p361_p2 = scmp.eq.s32.totalorder %s1473_s21, 5 }
   0xd   : > { %s2361_s23 = smov (%p37_p0, %s36_s23), 0  ;;  %s2363_s24 = smov (!%p37_p0, %s39_s24), %s1903_s19 }
   0xe   : > { %2343 = sst [smem:[#allocation13_spill]] %s2361_s23  ;;  %s347_s26 = ssub.s32 %s1899_s18, %s2361_s23 }
   0xf   : > { %p2044_p3 = por %p361_p2, %p360_p1  ;;  %p41_p4 = scmp.ge.s32.totalorder %s2363_s24, 3 }
  0x10   : > { %p348_p5 = scmp.eq.s32.totalorder %s347_s26, 0  ;;  %p366_p6 = scmp.ne.s32.totalorder %s1883_s30, %s1879_s29 }
  0x11   : > { %p367_p7 = scmp.eq.s32.totalorder %s1474_s22, 5  ;;  %s2365_s24 = smov (%p41_p4, %s2363_s24), 0 }
  0x12   : > { %2345 = sst [smem:[#allocation14_spill]] %s2365_s24  ;;  %p1477_p9 = scmp.ge.s32.totalorder %s1907_s20, 1 }
  0x13   : > { %s2053_s28 = scalar_select %p348_p5, %s1887_s15, %s350_s25  }
  0x14   : > { %p2055_p8 = por %p367_p7, %p366_p6  ;;  %p437_p10 = scmp.lt.s32.totalorder %s1907_s20, 7 }
  0x15   : > { %2346 = sst [smem:[#allocation15_spill]] %s2053_s28 }
  0x16   : > { %p438_p11 = pnand %p1477_p9, %p437_p10 }
  0x17   : > { %p488_p12 = scmp.lt.s32.totalorder (!%p438_p11), %s1891_s16, 1  ;;  %s2348_s0 = sld [smem:[#allocation16_spill]] (!%p438_p11)  ;;  %vm502_vm0 = vcmask (!%p438_p11), 130048  }
  0x18   : > { %441 = sbr.rel (%p438_p11) target bundleno = 1991 (0x7c7), region = 76  ;;  %s2337_s23 = sand.u32 (!%p438_p11), 1, %s1883_s30  }
  0x19   : > { %s1478_s24 = sshll.u32 (!%p438_p11), %s2337_s23, 4  ;;  %p1483_p13 = scmp.ne.s32.totalorder (!%p438_p11), %s1895_s17, 0 }
  0x1a   : > { %s2086_s18 = scalar_lea.vmem (!%p438_p11), [#allocation8], %s1478_s24 }
  0x1f   : > { %s489_s21 = scalar_select %p488_p12, %s1891_s16, 1 }
  0x20   : > { %p1484_p0 = scmp.ne.s32.totalorder (!%p1483_p13), %s1891_s16, 0 }
  0x21   : > { %s1516_s26 = sshll.u32 %s489_s21, 3  ;;  %s1515_s22 = sshll.u32 %s489_s21, 4 }
  0x22   : > { %s497_s25 = scalar_lea.vmem %s2319_s1, %s1516_s26  ;;  %s2069_s28 = scalar_lea.vmem %s2348_s0, %s1515_s22 }
  0x23   : > { %v1519_v0 = vld [vmem:[%s497_s25] sm:$0xff]  }
  0x24   : > { %v2071_v1 = vunpack.c.l.bf16 %v1519_v0  ;;  %v2073_v2 = vunpack.c.h.bf16 %v1519_v0 }
  0x26   : > { %v503_v3 = vsel %vm502_vm0, %v2071_v1, 0.0  ;;  %v506_v4 = vsel %vm502_vm0, %v2073_v2, 0.0 }
  0x27   : > { %504 = vadd.xlane.f32.xlu0 %v503_v3 }
  0x2b   : > { %507 = vadd.xlane.f32.xlu0 %v506_v4 }
  0xb4   : > { %v505_v5 = vpop.xlane.xlu0 %504 }
  0xb5   : > { %v509_v6 = vmax.f32 %v505_v5, 1.0 }
  0xb7   : > { %1805 = vrcp.f32 %v509_v6 }
  0xb8   : > { %v508_v7 = vpop.xlane.xlu0 %507 }
  0xb9   : > { %v510_v8 = vmax.f32 %v508_v7, 1.0 }
  0xbb   : > { %1807 = vrcp.f32 %v510_v8 }
  0xbf   : > { %516 = sbr.rel (%p1483_p13) target bundleno = 666 (0x29a), region = 80 }
  0xc1   : > { %v2082_v9 = vpop.eup %1805 }
  0xc5   : > { %v2084_v10 = vpop.eup %1807 }
  0xc6   : > { %520 = sbr.rel (%p1484_p0) target bundleno = 205 (0xcd), region = 84  ;;  %vm521_vm1 = vcmask (!%p1484_p0), 253952   ;;  %v1909_v11 = vmov (!%p1484_p0), 0.0  }
  0xc7   : > { %522 = vst.msk [vmem:[#allocation4] sm:$0x1] (!%p1484_p0), %vm521_vm1, %v1909_v11  ;;  %523 = vst.msk [vmem:[#allocation5] sm:$0x1] (!%p1484_p0), %vm521_vm1, %v1909_v11 }
  0xc8   : > { %524 = vst.msk [vmem:[#allocation6] sm:$0x1] (!%p1484_p0), %vm521_vm1, %v1909_v11  ;;  %525 = vst.msk [vmem:[#allocation7] sm:$0x1] (!%p1484_p0), %vm521_vm1, %v1909_v11 }
  0xcd PF: > { %v526_v12 = vld [vmem:[%s2069_s28] sm:$0xff]  ;;  %v527_v13 = vld [vmem:[%s2069_s28 + $0x8] sm:$0xff]  ;;  %1574 = vmatprep.mubr.msk.f32.mxu0 %vm502_vm0, %v2071_v1  ;;  %s1910_s19 = smov 8   ;;  %vm619_vm2 = vcmask 64512   ;;  %vm716_vm3 = vcmask 261120   ;;  %vm730_vm4 = vcmask 253952  }
  0xce   : > { %v1659_v14 = vpack.c.bf16 %v527_v13, %v526_v12  ;;  %613 = vrot.lane.b32.xlu0 %v526_v12, %s1910_s19  ;;  %v622_v15 = vld [vmem:[%s2320_s2] sm:$0xff]  ;;  %v623_v16 = vld [vmem:[%s2320_s2 + $0x8] sm:$0xff] }
  0xcf   : > { %v1663_v17 = vpack.c.bf16 %v623_v16, %v622_v15  ;;  %v1487_v26 = vld [vmem:[%s2321_s3] ss:$0 sm:$0xff]  ;;  %v732_v53 = vld [vmem:[#allocation5] sm:$0x1] }
  0xd0   : > { %1660 = vmatprep.subr.bf16.mxu0 %v1659_v14  ;;  %v719_v50 = vld [vmem:[#allocation4] sm:$0x1] }
  0xd1   : > { %1662 = vmatpush3.bf16.msra.mxu0 %v1659_v14  ;;  %1664 = vmatprep.subr.bf16.mxu1 %v1663_v17 }
  0xd2   : > { %615 = vrot.lane.b32.xlu0 %v527_v13, %s1910_s19  ;;  %1666 = vmatpush3.bf16.msra.mxu1 %v1663_v17  ;;  %s1490_s19 = sshll.u32 %s1891_s16, 4 }
  0xd3   : > { %s715_s21 = scalar_lea.vmem [#allocation2], %s1490_s19 }
  0xd4   : > { %1575 = vmatmul.mubr.msk.f32.vlgmr.msra.gmra.mrb[0].mxu0 %vm502_vm0, %v2073_v2 }
 0x140   : > { %v614_v18 = vpop.permute.xlu0 %613 }
 0x144   : > { %v616_v23 = vpop.permute.xlu0 %615 }
 0x1a7   : > { %v1576_v19 = vpop.f32.mrb[0].mxu0 }
 0x1a8   : > { %v610_v20 = vmul.f32 %v2084_v10, %v1576_v19  ;;  %v600_v21 = vpop.f32.mrb[1].mxu0 }
 0x1a9   : > { %v609_v22 = vmul.f32 %v2082_v9, %v600_v21 }
 0x1aa   : > { %v621_v25 = vsel %vm619_vm2, %v610_v20, %v616_v23 }
 0x1ab   : > { %v620_v24 = vsel %vm619_vm2, %v609_v22, %v614_v18 }
 0x1ac   : > { %1581 = vmatprep.mubr.msk.f32.mxu1 %vm502_vm0, %v620_v24 }
 0x1ad   : > { %1582 = vmatmul.mubr.msk.f32.vlgmr.msra.gmra.mrb[0].mxu1 %vm502_vm0, %v621_v25 }
 0x280   : > { %v1583_v27 = vpop.f32.mrb[0].mxu1 }
 0x281   : > { %v709_v28 = vadd.f32 %v1583_v27, %v1487_v26  ;;  %v703_v29 = vpop.f32.mrb[1].mxu1 }
 0x282   : > { %v704_v30 = vadd.f32 %v1487_v26, %v703_v29 }
 0x283   : > { %v713_v31 = vmax.f32 %v709_v28, 0.0 }
 0x284   : > { %v712_v32 = vmax.f32 %v704_v30, 0.0 }
 0x285   : > { %718 = vst.msk [vmem:[%s715_s21 + $0x8] sm:$0xff] %vm716_vm3, %v713_v31  ;;  %v721_v33 = vsel %vm716_vm3, %v713_v31, 0.0  ;;  %v734_v34 = vmul.f32 %v713_v31, %v713_v31 }
 0x286   : > { %717 = vst.msk [vmem:[%s715_s21] sm:$0xff] %vm716_vm3, %v712_v32  ;;  %v720_v35 = vsel %vm716_vm3, %v712_v32, 0.0  ;;  %v733_v36 = vmul.f32 %v712_v32, %v712_v32 }
 0x287   : > { %v736_v37 = vsel %vm716_vm3, %v734_v34, 0.0  ;;  %v722_v38 = vadd.f32 %v721_v33, %v720_v35 }
 0x288   : > { %v735_v39 = vsel %vm716_vm3, %v733_v36, 0.0 }
 0x289   : > { %v723_v40 = vrot.slane %v722_v38, 4  ;;  %v737_v41 = vadd.f32 %v736_v37, %v735_v39 }
 0x28b   : > { %v724_v42 = vadd.f32 %v723_v40, %v722_v38  ;;  %v738_v43 = vrot.slane %v737_v41, 4 }
 0x28d   : > { %v725_v44 = vrot.slane %v724_v42, 2  ;;  %v739_v45 = vadd.f32 %v738_v43, %v737_v41 }
 0x28f   : > { %v726_v46 = vadd.f32 %v725_v44, %v724_v42  ;;  %v740_v47 = vrot.slane %v739_v45, 2 }
 0x291   : > { %v727_v48 = vrot.slane %v726_v46, 1  ;;  %v741_v49 = vadd.f32 %v740_v47, %v739_v45 }
 0x293   : > { %v728_v51 = vadd.f32 %v727_v48, %v726_v46  ;;  %v742_v52 = vrot.slane %v741_v49, 1 }
 0x295   : > { %v729_v54 = vadd.f32 %v728_v51, %v719_v50  ;;  %v743_v55 = vadd.f32 %v742_v52, %v741_v49 }
 0x297   : > { %731 = vst.msk [vmem:[#allocation4] sm:$0x1] %vm730_vm4, %v729_v54  ;;  %v744_v56 = vadd.f32 %v743_v55, %v732_v53 }
 0x299   : > { %745 = vst.msk [vmem:[#allocation5] sm:$0x1] %vm730_vm4, %v744_v56 }
 0x29a PF: > { %p1491_p1 = scmp.ne.s32.totalorder %s1895_s17, 1 }
 0x29b   : > { %1588 = vmatprep.mubr.msk.f32.mxu0 (!%p1491_p1), %vm502_vm0, %v2071_v1  ;;  %v885_v62 = vld [vmem:[%s2324_s6] sm:$0xff] (!%p1491_p1)  ;;  %v886_v63 = vld [vmem:[%s2324_s6 + $0x8] sm:$0xff] (!%p1491_p1)  ;;  %v887_v0 = vld [vmem:[%s2324_s6 + $0x10] sm:$0xff] (!%p1491_p1)  ;;  %v765_v3 = vlaneseq (!%p1491_p1)  ;;  %s1492_s23 = sshll.u32 (!%p1491_p1), %s1891_s16, 4  ;;  %vm789_vm5 = vcmask (!%p1491_p1), 261120   ;;  %s1911_s26 = smov (!%p1491_p1), 32  }
 0x29c   : > { %749 = sbr.rel (%p1491_p1) target bundleno = 1158 (0x486), region = 88  ;;  %v1671_v4 = vpack.c.bf16 (!%p1491_p1), %v886_v63, %v885_v62  ;;  %v888_v5 = vld [vmem:[%s2324_s6 + $0x18] sm:$0xff] (!%p1491_p1)  ;;  %v889_v8 = vld [vmem:[%s2324_s6 + $0x20] sm:$0xff] (!%p1491_p1)  ;;  %v890_v11 = vld [vmem:[%s2324_s6 + $0x28] sm:$0xff] (!%p1491_p1)  ;;  %s751_s0 = scalar_lea.vmem (!%p1491_p1), [#allocation2], %s1492_s23  ;;  %vm900_vm6 = vcmask (!%p1491_p1), 523264  }
 0x29d   : > { %v1675_v7 = vpack.c.bf16 (!%p1491_p1), %v888_v5, %v887_v0  ;;  %v766_v13 = vshrl.u32 (!%p1491_p1), %v765_v3, 7  ;;  %v1679_v14 = vpack.c.bf16 (!%p1491_p1), %v890_v11, %v889_v8  ;;  %v752_v17 = vld [vmem:[%s751_s0] sm:$0xff] (!%p1491_p1)  ;;  %v753_v18 = vld [vmem:[%s751_s0 + $0x8] sm:$0xff] (!%p1491_p1)  ;;  %v891_v31 = vld [vmem:[%s2324_s6 + $0x30] sm:$0xff] (!%p1491_p1)  ;;  %s984_s21 = scalar_lea.vmem (!%p1491_p1), [#allocation3], %s1492_s23  ;;  %vm998_vm7 = vcmask (!%p1491_p1), 253952  }
 0x29e   : > { %v754_v57 = vld [vmem:[#allocation4] sm:$0x1] (!%p1491_p1)  ;;  %1672 = vmatprep.subr.bf16.mxu1 (!%p1491_p1), %v1671_v4  ;;  %v892_v32 = vld [vmem:[%s2324_s6 + $0x38] sm:$0xff] (!%p1491_p1) }
 0x29f   : > { %v755_v59 = vmul.f32 (!%p1491_p1), 0.03125, %v754_v57  ;;  %1674 = vmatpush3.bf16.msra.mxu1 (!%p1491_p1), %v1671_v4  ;;  %v767_v15 = vsub.s32 (!%p1491_p1), 0, %v766_v13  ;;  %v762_v19 = vld [vmem:[%s2322_s4] sm:$0x1] (!%p1491_p1)  ;;  %v1683_v33 = vpack.c.bf16 (!%p1491_p1), %v892_v32, %v891_v31  ;;  %v987_v4 = vld [vmem:[#allocation6] sm:$0x1] (!%p1491_p1) }
 0x2a0   : > { %v756_v58 = vld [vmem:[#allocation5] sm:$0x1] (!%p1491_p1)  ;;  %1676 = vmatprep.subr.bf16.mxu1 (!%p1491_p1), %v1675_v7  ;;  %v1493_v25 = vld [vmem:[%s2323_s5] ss:$0 sm:$0xff] (!%p1491_p1) }
 0x2a1   : > { %v757_v60 = vmul.f32 (!%p1491_p1), 0.03125, %v756_v58  ;;  %v758_v61 = vmul.f32 (!%p1491_p1), %v755_v59, %v755_v59  ;;  %v768_v16 = vrot.slane (!%p1491_p1), %v755_v59, %v767_v15  ;;  %v1496_v42 = vld [vmem:[%s2325_s7] ss:$0 sm:$0xff] (!%p1491_p1) }
 0x2a3   : > { %v759_v6 = vsub.f32 %v757_v60, %v758_v61  ;;  %1678 = vmatpush3.bf16.msra.mxu1 %v1675_v7  ;;  %v770_v22 = vsub.f32 %v752_v17, %v768_v16  ;;  %v771_v23 = vsub.f32 %v753_v18, %v768_v16  ;;  %v1000_v7 = vld [vmem:[#allocation7] sm:$0x1] }
 0x2a4   : > { %1680 = vmatprep.subr.bf16.mxu1 %v1679_v14 }
 0x2a5   : > { %v760_v12 = vadd.f32 1e-05, %v759_v6 }
 0x2a7   : > { %1809 = vrsqrt.f32 %v760_v12  ;;  %1682 = vmatpush3.bf16.msra.mxu1 %v1679_v14 }
 0x2a8   : > { %1684 = vmatprep.subr.bf16.mxu1 %v1683_v33 }
 0x2ab   : > { %1686 = vmatpush3.bf16.msra.mxu1 %v1683_v33 }
 0x2b1   : > { %v1810_v20 = vpop.eup %1809 }
 0x2b2   : > { %v763_v21 = vmul.f32 %v1810_v20, %v762_v19 }
 0x2b4   : > { %v776_v24 = vrot.slane %v763_v21, %v767_v15 }
 0x2b6   : > { %v778_v26 = vmul.f32 %v776_v24, %v770_v22  ;;  %v779_v27 = vmul.f32 %v776_v24, %v771_v23 }
 0x2b8   : > { %v787_v28 = vadd.f32 %v1493_v25, %v778_v26  ;;  %v788_v29 = vadd.f32 %v1493_v25, %v779_v27 }
 0x2ba   : > { %790 = vst.msk [vmem:[%s751_s0] sm:$0xff] %vm789_vm5, %v787_v28  ;;  %791 = vst.msk [vmem:[%s751_s0 + $0x8] sm:$0xff] %vm789_vm5, %v788_v29  ;;  %v1667_v30 = vpack.c.bf16 %v788_v29, %v787_v28  ;;  %877 = vrot.lane.b32.xlu0 %v787_v28, %s1911_s26 }
 0x2bc   : > { %1668 = vmatprep.subr.bf16.mxu0 %v1667_v30 }
 0x2bd   : > { %1670 = vmatpush3.bf16.msra.mxu0 %v1667_v30 }
 0x2be   : > { %879 = vrot.lane.b32.xlu0 %v788_v29, %s1911_s26 }
 0x2c0   : > { %1589 = vmatmul.mubr.msk.f32.vlgmr.msra.gmra.mrb[0].mxu0 %vm502_vm0, %v2073_v2 }
 0x32c   : > { %v878_v34 = vpop.permute.xlu0 %877 }
 0x330   : > { %v880_v39 = vpop.permute.xlu0 %879 }
 0x393   : > { %v1590_v35 = vpop.f32.mrb[0].mxu0 }
 0x394   : > { %v874_v36 = vmul.f32 %v2084_v10, %v1590_v35  ;;  %v864_v37 = vpop.f32.mrb[1].mxu0 }
 0x395   : > { %v873_v38 = vmul.f32 %v2082_v9, %v864_v37 }
 0x396   : > { %v884_v41 = vsel %vm789_vm5, %v874_v36, %v880_v39 }
 0x397   : > { %v883_v40 = vsel %vm789_vm5, %v873_v38, %v878_v34 }
 0x398   : > { %1607 = vmatprep.mubr.msk.f32.mxu1 %vm900_vm6, %v883_v40 }
 0x399   : > { %1608 = vmatmul.mubr.msk.f32.vlgmr.msra.gmra.mrb[0].mxu1 %vm900_vm6, %v884_v41 }
 0x46c   : > { %v1609_v43 = vpop.f32.mrb[0].mxu1 }
 0x46d   : > { %v979_v44 = vadd.f32 %v1609_v43, %v1496_v42  ;;  %v973_v45 = vpop.f32.mrb[1].mxu1 }
 0x46e   : > { %v974_v46 = vadd.f32 %v1496_v42, %v973_v45 }
 0x46f   : > { %v983_v47 = vmax.f32 %v979_v44, 0.0 }
 0x470   : > { %v982_v48 = vmax.f32 %v974_v46, 0.0 }
 0x471   : > { %986 = vst.msk [vmem:[%s984_s21 + $0x8] sm:$0xff] %vm789_vm5, %v983_v47  ;;  %v989_v49 = vsel %vm789_vm5, %v983_v47, 0.0  ;;  %v1002_v50 = vmul.f32 %v983_v47, %v983_v47 }
 0x472   : > { %985 = vst.msk [vmem:[%s984_s21] sm:$0xff] %vm789_vm5, %v982_v48  ;;  %v988_v51 = vsel %vm789_vm5, %v982_v48, 0.0  ;;  %v1001_v52 = vmul.f32 %v982_v48, %v982_v48 }
 0x473   : > { %v1004_v53 = vsel %vm789_vm5, %v1002_v50, 0.0  ;;  %v990_v54 = vadd.f32 %v989_v49, %v988_v51 }
 0x474   : > { %v1003_v55 = vsel %vm789_vm5, %v1001_v52, 0.0 }
 0x475   : > { %v991_v56 = vrot.slane %v990_v54, 4  ;;  %v1005_v57 = vadd.f32 %v1004_v53, %v1003_v55 }
 0x477   : > { %v992_v58 = vadd.f32 %v991_v56, %v990_v54  ;;  %v1006_v59 = vrot.slane %v1005_v57, 4 }
 0x479   : > { %v993_v60 = vrot.slane %v992_v58, 2  ;;  %v1007_v61 = vadd.f32 %v1006_v59, %v1005_v57 }
 0x47b   : > { %v994_v62 = vadd.f32 %v993_v60, %v992_v58  ;;  %v1008_v63 = vrot.slane %v1007_v61, 2 }
 0x47d   : > { %v995_v0 = vrot.slane %v994_v62, 1  ;;  %v1009_v3 = vadd.f32 %v1008_v63, %v1007_v61 }
 0x47f   : > { %v996_v5 = vadd.f32 %v995_v0, %v994_v62  ;;  %v1010_v6 = vrot.slane %v1009_v3, 1 }
 0x481   : > { %v997_v8 = vadd.f32 %v996_v5, %v987_v4  ;;  %v1011_v11 = vadd.f32 %v1010_v6, %v1009_v3 }
 0x483   : > { %999 = vst.msk [vmem:[#allocation6] sm:$0x1] %vm998_vm7, %v997_v8  ;;  %v1012_v12 = vadd.f32 %v1011_v11, %v1000_v7 }
 0x485   : > { %1013 = vst.msk [vmem:[#allocation7] sm:$0x1] %vm998_vm7, %v1012_v12 }
 0x486 PF: > { %p1499_p2 = scmp.ne.s32.totalorder %s1895_s17, 2 }
 0x487   : > { %1614 = vmatprep.mubr.msk.f32.mxu1 (!%p1499_p2), %vm502_vm0, %v2071_v1  ;;  %v1036_v18 = vlaneseq (!%p1499_p2)  ;;  %s2338_s23 = sshll.u32 (!%p1499_p2), %s1891_s16, 4  ;;  %v1033_v26 = vld [vmem:[%s2326_s8] sm:$0x1] (!%p1499_p2)  ;;  %v1155_v35 = vld [vmem:[%s2328_s10 + $0x8] sm:$0xff] (!%p1499_p2)  ;;  %v1156_v40 = vld [vmem:[%s2328_s10 + $0x10] sm:$0xff] (!%p1499_p2)  ;;  %vm1169_vm8 = vcmask (!%p1499_p2), 523264  }
 0x488   : > { %1017 = sbr.rel (%p1499_p2) target bundleno = 1964 (0x7ac), region = 92  ;;  %s1022_s17 = scalar_lea.vmem (!%p1499_p2), [#allocation3], %s2338_s23  ;;  %v1501_v31 = vld [vmem:[%s2327_s9] ss:$0 sm:$0xff] (!%p1499_p2)  ;;  %v1157_v41 = vld [vmem:[%s2328_s10 + $0x18] sm:$0xff] (!%p1499_p2)  ;;  %v1159_v44 = vld [vmem:[%s2328_s10 + $0x28] sm:$0xff] (!%p1499_p2) }
 0x489   : > { %v1037_v21 = vshrl.u32 (!%p1499_p2), %v1036_v18, 7  ;;  %v1023_v24 = vld [vmem:[%s1022_s17] sm:$0xff] (!%p1499_p2)  ;;  %v1024_v25 = vld [vmem:[%s1022_s17 + $0x8] sm:$0xff] (!%p1499_p2)  ;;  %s1912_s17 = smov (!%p1499_p2), 32   ;;  %v1695_v42 = vpack.c.bf16 (!%p1499_p2), %v1157_v41, %v1156_v40  ;;  %v1160_v46 = vld [vmem:[%s2328_s10 + $0x30] sm:$0xff] (!%p1499_p2)  ;;  %vm1151_vm9 = vcmask (!%p1499_p2), 261120  }
 0x48a   : > { %v1025_v13 = vld [vmem:[#allocation6] sm:$0x1] (!%p1499_p2)  ;;  %v1161_v47 = vld [vmem:[%s2328_s10 + $0x38] sm:$0xff] (!%p1499_p2)  ;;  %v1268_v61 = vld [vmem:[%s2330_s12 + $0x28] sm:$0xff] (!%p1499_p2)  ;;  %s1913_s0 = smov (!%p1499_p2), 64   ;;  %s2349_s19 = sshll.u32 (!%p1499_p2), %s1891_s16, 4 }
 0x48b   : > { %v1026_v15 = vmul.f32 (!%p1499_p2), 0.03125, %v1025_v13  ;;  %v1038_v22 = vsub.s32 (!%p1499_p2), 0, %v1037_v21  ;;  %v1154_v34 = vld [vmem:[%s2328_s10] sm:$0xff] (!%p1499_p2)  ;;  %v1703_v48 = vpack.c.bf16 (!%p1499_p2), %v1161_v47, %v1160_v46  ;;  %v1266_v58 = vld [vmem:[%s2330_s12 + $0x18] sm:$0xff] (!%p1499_p2)  ;;  %v1269_v63 = vld [vmem:[%s2330_s12 + $0x30] sm:$0xff] (!%p1499_p2)  ;;  %s1019_s21 = scalar_lea.vmem (!%p1499_p2), [#allocation2], %s2349_s19 }
 0x48c   : > { %v1027_v14 = vld [vmem:[#allocation7] sm:$0x1] (!%p1499_p2)  ;;  %v1691_v39 = vpack.c.bf16 (!%p1499_p2), %v1155_v35, %v1154_v34  ;;  %v1270_v0 = vld [vmem:[%s2330_s12 + $0x38] sm:$0xff] (!%p1499_p2)  ;;  %v1272_v5 = vld [vmem:[%s2330_s12 + $0x48] sm:$0xff] (!%p1499_p2)  ;;  %vm1280_vm10 = vcmask (!%p1499_p2), 654336  }
 0x48d   : > { %v1028_v16 = vmul.f32 (!%p1499_p2), 0.03125, %v1027_v14  ;;  %v1029_v17 = vmul.f32 (!%p1499_p2), %v1026_v15, %v1026_v15  ;;  %v1039_v23 = vrot.slane (!%p1499_p2), %v1026_v15, %v1038_v22  ;;  %v1158_v43 = vld [vmem:[%s2328_s10 + $0x20] sm:$0xff] (!%p1499_p2)  ;;  %v1719_v3 = vpack.c.bf16 (!%p1499_p2), %v1270_v0, %v1269_v63 }
 0x48e   : > { %v1699_v45 = vpack.c.bf16 (!%p1499_p2), %v1159_v44, %v1158_v43  ;;  %v1263_v56 = vld [vmem:[%s2330_s12] sm:$0xff] (!%p1499_p2) }
 0x48f   : > { %v1030_v19 = vsub.f32 %v1028_v16, %v1029_v17  ;;  %v1041_v28 = vsub.f32 %v1023_v24, %v1039_v23  ;;  %v1042_v29 = vsub.f32 %v1024_v25, %v1039_v23  ;;  %v1267_v60 = vld [vmem:[%s2330_s12 + $0x20] sm:$0xff]  ;;  %v1021_v17 = vld [vmem:[%s1019_s21 + $0x8] sm:$0xff] }
 0x490   : > { %v1715_v62 = vpack.c.bf16 %v1268_v61, %v1267_v60  ;;  %v1271_v4 = vld [vmem:[%s2330_s12 + $0x40] sm:$0xff] }
 0x491   : > { %v1031_v20 = vadd.f32 1e-05, %v1030_v19  ;;  %v1723_v6 = vpack.c.bf16 %v1272_v5, %v1271_v4  ;;  %v1504_v7 = vld [vmem:[%s2329_s11] ss:$0 sm:$0xff] }
 0x492   : > { %v1020_v14 = vld [vmem:[%s1019_s21] sm:$0xff] }
 0x493   : > { %1811 = vrsqrt.f32 %v1031_v20 }
 0x49d   : > { %v1812_v1 = vpop.eup %1811 }
 0x49e   : > { %v1034_v27 = vmul.f32 %v1812_v1, %v1033_v26 }
 0x4a0   : > { %v1047_v30 = vrot.slane %v1034_v27, %v1038_v22  ;;  %v1507_v22 = vld [vmem:[%s2331_s13] ss:$0 sm:$0xff] }
 0x4a2   : > { %v1049_v32 = vmul.f32 %v1047_v30, %v1041_v28  ;;  %v1050_v33 = vmul.f32 %v1047_v30, %v1042_v29 }
 0x4a4   : > { %v1058_v36 = vadd.f32 %v1501_v31, %v1049_v32  ;;  %v1059_v37 = vadd.f32 %v1501_v31, %v1050_v33 }
 0x4a6   : > { %v1687_v38 = vpack.c.bf16 %v1059_v37, %v1058_v36  ;;  %1145 = vrot.lane.b32.xlu0 %v1058_v36, %s1912_s17 }
 0x4a8   : > { %1688 = vmatprep.subr.bf16.mxu1 %v1687_v38 }
 0x4a9   : > { %1690 = vmatpush3.bf16.msra.mxu1 %v1687_v38 }
 0x4aa   : > { %1147 = vrot.lane.b32.xlu0 %v1059_v37, %s1912_s17  ;;  %1692 = vmatprep.subr.bf16.mxu1 %v1691_v39 }
 0x4ac   : > { %1615 = vmatmul.mubr.msk.f32.vlgmr.msra.gmra.mrb[0].mxu1 %vm502_vm0, %v2073_v2 }
 0x4ad   : > { %1694 = vmatpush3.bf16.msra.mxu1 %v1691_v39 }
 0x4ae   : > { %1696 = vmatprep.subr.bf16.mxu1 %v1695_v42 }
 0x4b1   : > { %1698 = vmatpush3.bf16.msra.mxu1 %v1695_v42 }
 0x4b2   : > { %1700 = vmatprep.subr.bf16.mxu1 %v1699_v45 }
 0x4b5   : > { %1702 = vmatpush3.bf16.msra.mxu1 %v1699_v45 }
 0x4b6   : > { %1704 = vmatprep.subr.bf16.mxu1 %v1703_v48 }
 0x4b9   : > { %1706 = vmatpush3.bf16.msra.mxu1 %v1703_v48 }
 0x518   : > { %v1146_v49 = vpop.permute.xlu0 %1145 }
 0x519   : > { %v1259_v15 = vsel %vm1151_vm9, %v1020_v14, %v1146_v49 }
 0x51c   : > { %v1148_v53 = vpop.permute.xlu0 %1147 }
 0x51d   : > { %v1260_v19 = vsel %vm1151_vm9, %v1021_v17, %v1148_v53 }
 0x57f   : > { %v1616_v50 = vpop.f32.mrb[0].mxu1 }
 0x580   : > { %v1142_v2 = vmul.f32 %v2084_v10, %v1616_v50  ;;  %v1132_v51 = vpop.f32.mrb[1].mxu1  ;;  %v1264_v10 = vld [vmem:[%s2330_s12 + $0x8] sm:$0xff] }
 0x581   : > { %v1141_v52 = vmul.f32 %v2082_v9, %v1132_v51  ;;  %v1265_v9 = vld [vmem:[%s2330_s12 + $0x10] sm:$0xff]  ;;  %v1707_v57 = vpack.c.bf16 %v1264_v10, %v1263_v56 }
 0x582   : > { %v1153_v55 = vsel %vm1151_vm9, %v1142_v2, %v1148_v53  ;;  %v1711_v59 = vpack.c.bf16 %v1266_v58, %v1265_v9 }
 0x583   : > { %v1152_v54 = vsel %vm1151_vm9, %v1141_v52, %v1146_v49  ;;  %1708 = vmatprep.subr.bf16.mxu0 %v1707_v57 }
 0x584   : > { %1633 = vmatprep.mubr.msk.f32.mxu1 %vm1169_vm8, %v1152_v54  ;;  %1710 = vmatpush3.bf16.msra.mxu0 %v1707_v57 }
 0x585   : > { %1634 = vmatmul.mubr.msk.f32.vlgmr.msra.gmra.mrb[2].mxu1 %vm1169_vm8, %v1153_v55  ;;  %1712 = vmatprep.subr.bf16.mxu0 %v1711_v59 }
 0x588   : > { %1714 = vmatpush3.bf16.msra.mxu0 %v1711_v59 }
 0x589   : > { %1716 = vmatprep.subr.bf16.mxu0 %v1715_v62 }
 0x58c   : > { %1718 = vmatpush3.bf16.msra.mxu0 %v1715_v62 }
 0x58d   : > { %1720 = vmatprep.subr.bf16.mxu0 %v1719_v3 }
 0x590   : > { %1722 = vmatpush3.bf16.msra.mxu0 %v1719_v3 }
 0x591   : > { %1724 = vmatprep.subr.bf16.mxu0 %v1723_v6 }
 0x594   : > { %1726 = vmatpush3.bf16.msra.mxu0 %v1723_v6 }
 0x658   : > { %v1635_v8 = vpop.f32.mrb[2].mxu1 }
 0x659   : > { %v1242_v11 = vpop.f32.mrb[3].mxu1  ;;  %v1248_v13 = vadd.f32 %v1635_v8, %v1504_v7 }
 0x65a   : > { %v1243_v12 = vadd.f32 %v1504_v7, %v1242_v11 }
 0x65c   : > { %1253 = vrot.lane.b32.xlu1 %v1243_v12, %s1913_s0 }
 0x660   : > { %1255 = vrot.lane.b32.xlu1 %v1248_v13, %s1913_s0 }
 0x6ce   : > { %v1254_v16 = vpop.permute.xlu1 %1253 }
 0x6cf   : > { %v1261_v18 = vsel %vm1169_vm8, %v1259_v15, %v1254_v16 }
 0x6d0   : > { %1656 = vmatprep.mubr.msk.f32.mxu0 %vm1280_vm10, %v1261_v18 }
 0x6d2   : > { %v1256_v20 = vpop.permute.xlu1 %1255 }
 0x6d3   : > { %v1262_v21 = vsel %vm1169_vm8, %v1260_v19, %v1256_v20 }
 0x6d4   : > { %1657 = vmatmul.mubr.msk.f32.vlgmr.msra.gmra.mrb[0].mxu0 %vm1280_vm10, %v1262_v21 }
 0x7a7   : > { %v1658_v23 = vpop.f32.mrb[0].mxu0 }
 0x7a8   : > { %v1359_v24 = vadd.f32 %v1658_v23, %v1507_v22  ;;  %v1353_v25 = vpop.f32.mrb[1].mxu0 }
 0x7a9   : > { %v1354_v26 = vadd.f32 %v1507_v22, %v1353_v25 }
 0x7aa   : > { %1363 = vst.msk [vmem:[%s2086_s18 + $0x8] sm:$0xff] %vm502_vm0, %v1359_v24 }
 0x7ab   : > { %1362 = vst.msk [vmem:[%s2086_s18] sm:$0xff] %vm502_vm0, %v1354_v26 }
 0x7ac PF: > { %s1517_s26 = sshll.u32 %s1891_s16, 8  ;;  %s2350_s28 = sld [smem:[#allocation17_spill]] }
 0x7ad   : > { %s1378_s0 = sshll.u32 %s2086_s18, 4  ;;  %s2351_s19 = sand.u32 1, %s1883_s30   ;;  %s2262_s0 = int_to_ptr.vmem [resolvable:$true] %s1378_s0 }
 0x7ae   : > { %s2266_s21 = scalar_lea.sflag [#allocation9], %s2351_s19  ;;  %s1813_s17 = scalar_lea.vmem %s2262_s0, 256 }
 0x7af   : > { %p1814_p4 = scmp.ne.s32.totalorder %s2262_s0, %s1813_s17  ;;  %s1914_s16 = smov [#allocation8]  }
 0x7b0   : > { %s1817_s23 = sshll.u32 %s1914_s16, 4  ;;  %s1818_s23 = int_to_ptr.vmem [resolvable:$false] %s1817_s23 }
 0x7b1   : > { %p1815_p5 = pnand %p1814_p4, %p2044_p3  ;;  %s1819_s22 = scalar_lea.vmem %s1818_s23, 512 }
 0x7b2   : > { %s2259_s24 = scalar_lea.hbm %s2350_s28, %s1517_s26  ;;  %p1820_p7 = scmp.lt.s32.totalorder %s2262_s0, %s1818_s23 }
 0x7b3   : > { %p1816_p6 = pneg %p1815_p5  ;;  %p1821_p9 = scmp.lt.s32.totalorder %s1819_s22, %s1813_s17 }
 0x7b5   : > { %p1822_p10 = por %p1821_p9, %p1820_p7 }
 0x7b7   : > { %p1823_p11 = pnand %p1822_p10, %p1816_p6 }
 0x7b9   : > { %1826 = shalt.err (!%p1823_p11)
}
 0x7ba   : > { %s1827_s18 = scalar_lea.hbm %s2259_s24, 256  ;;  %s1831_s19 = scalar_lea.hbm %s2350_s28, 512 }
 0x7bb   : > { %p1828_p12 = scmp.ne.s32.totalorder %s2259_s24, %s1827_s18  ;;  %p1832_p1 = scmp.lt.u32.totalorder %s2259_s24, %s2350_s28 }
 0x7bc   : > { %p1833_p2 = scmp.lt.u32.totalorder %s1831_s19, %s1827_s18  ;;  %p1835_p5 = scmp.lt.u32.totalorder %s1827_s18, %s2259_s24 }
 0x7bd   : > { %p1829_p13 = pnand %p1828_p12, %p2044_p3 }
 0x7be   : > { %p1834_p4 = por %p1833_p2, %p1832_p1 }
 0x7bf   : > { %p1830_p0 = pneg %p1829_p13 }
 0x7c0   : > { %p1836_p6 = por %p1835_p5, %p1834_p4 }
 0x7c2   : > { %p1837_p7 = pnand %p1836_p6, %p1830_p0 }
 0x7c4   : > { %1840 = shalt.err (!%p1837_p7)
}
 0x7c5   : > { %s1915_s17 = smov 128   ;;  %s1916_s22 = smov 8  }
 0x7c6   : > { %1727 = dma.vmem_to_hbm [thread:$0]  (%p2044_p3), %s2262_s0, 256, %s2259_s24, %s2266_s21, %s1915_s17, %s1915_s17, %s1916_s22  }
 0x7c7 PF: > { %p1733_p9 = scmp.ge.s32.totalorder %s1907_s20, 2  ;;  %s1393_s26 = sand.u32 1, %s1879_s29  }
 0x7c8   : > { %s1394_s18 = scalar_lea.sflag [#allocation9], %s1393_s26 }
 0x7c9   : > { %p1730_p10 = pnand %p1733_p9, %p2055_p8 }
 0x7cb   : > { %1874 = dma.done.wait (!%p1730_p10), %s1394_s18, 256  }
 0x7cc   : > { %1876 = vsyncadd (!%p1730_p10), %s1394_s18, 4294967040  ;;  %s27_s20 = sadd.s32 1, %s1907_s20   ;;  %s2352_s25 = sld [smem:[#allocation15_spill]] }
 0x7cd   : > { %p24_p11 = scmp.ge.s32.totalorder %s27_s20, 8   ;;  %s2353_s16 = sld [smem:[#allocation11_spill]] }
 0x7ce   : > { %s2354_s17 = sld [smem:[#allocation12_spill]]  ;;  %s2355_s18 = sld [smem:[#allocation13_spill]] }
 0x7cf   : > { %s2356_s19 = sld [smem:[#allocation14_spill]]  ;;  %s2357_s29 = smov %s1883_s30 }
 0x7d0   : > { %s2358_s30 = smov %s1887_s15  ;;  %26 = sbr.rel (!%p24_p11) target bundleno = 8 (0x8), region = 135 }
 0x7d2   : > { %s2359_s15 = smov %s2352_s25 }
 0x7d7   :  { %1399 = vsyncpa [#allocation9], 1 }
 0x7d8   :  { %1401 = vsyncpa [#allocation9 + $0x1], 1 }

</bundles_post_ra>
